<compile_context>
chip_gen: v7x
topology: tpu7x:2x2x1
jax: 0.10.0
libtpu: 0.0.40
codegen_flags: <defaults>
</compile_context>

<pallas_src>
import jax
import jax.numpy as jnp
from jax.experimental import pallas as pl
from jax.experimental.pallas import tpu as pltpu


# ---------------------------------------------------------------------------
# Kernel: fused ensemble forward for one batch tile.
#   out = ReLU(x @ W1 + b1) @ W2 + b2      (W2/b2 already carry the 0.5 factor)
# ---------------------------------------------------------------------------
def ensemble_kernel(x_ref, w1_ref, b1_ref, w2_ref, b2_ref, o_ref):
    # Cast x f32 -> bf16 in-kernel (saves a separate XLA convert pass over HBM).
    x = x_ref[...].astype(jnp.bfloat16)
    # First GEMM: bf16 x bf16 -> f32 accumulation on the MXU.
    h = jnp.dot(x, w1_ref[...], preferred_element_type=jnp.float32) + b1_ref[...]
    h = jnp.maximum(h, 0.0)
    # Second (tiny) GEMM: bf16 operands, f32 accumulation; 0.5 folded into W2/b2.
    o_ref[...] = jnp.dot(h.astype(jnp.bfloat16), w2_ref[...],
                         preferred_element_type=jnp.float32) + b2_ref[...]


# ---------------------------------------------------------------------------
# One-time glue: fuse the two sub-models and pad to TPU-friendly shapes.
# ---------------------------------------------------------------------------
def fuse_and_pad_params(params, hidden_pad=128, class_pad=128):
    (w1a, b1a, w2a, b2a, w1b, b1b, w2b, b2b) = params
    in_dim, hidden = w1a.shape
    num_classes = w2a.shape[1]
    two_h = 2 * hidden

    # Algebraic fusion of the ensemble (0.5 average folded into W2 / b2).
    w1 = jnp.concatenate([w1a, w1b], axis=1)                       # [D, 2H] bf16
    b1 = jnp.concatenate([b1a, b1b], axis=1)                       # [1, 2H] f32
    w2 = 0.5 * jnp.concatenate([w2a, w2b], axis=0)                 # [2H, C] f32
    b2 = 0.5 * (b2a + b2b)                                         # [1, C]  f32

    # Zero-pad hidden -> 128 and classes -> 128 (lane-dense GEMMs + output store).
    w1p = jnp.zeros((in_dim, hidden_pad), jnp.bfloat16).at[:, :two_h].set(w1)
    b1p = jnp.zeros((1, hidden_pad), jnp.float32).at[:, :two_h].set(b1)
    w2p = (jnp.zeros((hidden_pad, class_pad), jnp.float32)
           .at[:two_h, :num_classes].set(w2)).astype(jnp.bfloat16)
    b2p = jnp.zeros((1, class_pad), jnp.float32).at[:, :num_classes].set(b2)
    return (w1p, b1p, w2p, b2p)


# ---------------------------------------------------------------------------
# Wrapper: flatten NCHW, run the fused Pallas kernel over batch tiles, slice.
# ---------------------------------------------------------------------------
def _round_up(a, m):
    return ((a + m - 1) // m) * m


def ensemble_forward(x_nchw, fused_params, num_classes):
    w1, b1, w2, b2 = fused_params
    B = x_nchw.shape[0]
    D, HP = w1.shape
    CP = w2.shape[1]
    # NOTE: x blocks are lane-dense because D = C*H*W is a multiple of 128;
    # if the input shape changes so D % 128 != 0, pad D (zero rows in W1).

    # Flatten NCHW row-major -> [B, D]; stays f32 (cast to bf16 inside kernel).
    x_flat = x_nchw.reshape(B, -1)

    # Batch tile: multiple of 16 (bf16 sublane packing), capped at 512, and
    # chosen so large batches give >=2 grid steps (both v7x TensorCores busy).
    TB = min(512, max(16, _round_up(pl.cdiv(B, 2), 16)))
    grid = (pl.cdiv(B, TB),)   # ragged last tile handled by Pallas; no jnp.pad

    cost = pl.CostEstimate(
        flops=2 * B * D * HP + 2 * B * HP * CP,
        transcendentals=0,
        bytes_accessed=(x_flat.size * 4 + w1.size * 2 + b1.size * 4
                        + w2.size * 2 + b2.size * 4 + B * CP * 4),
    )

    out = pl.pallas_call(
        ensemble_kernel,
        out_shape=jax.ShapeDtypeStruct((B, CP), jnp.float32),
        grid=grid,
        in_specs=[
            pl.BlockSpec((TB, D), lambda i: (i, 0)),    # batch-tiled activations (f32)
            pl.BlockSpec((D, HP), lambda i: (0, 0)),    # resident fused W1 (bf16)
            pl.BlockSpec((1, HP), lambda i: (0, 0)),    # resident fused b1 (f32)
            pl.BlockSpec((HP, CP), lambda i: (0, 0)),   # resident fused W2 (bf16, x0.5)
            pl.BlockSpec((1, CP), lambda i: (0, 0)),    # resident fused b2 (f32, x0.5)
        ],
        out_specs=pl.BlockSpec((TB, CP), lambda i: (i, 0)),
        compiler_params=pltpu.CompilerParams(
            dimension_semantics=("parallel",)),
        cost_estimate=cost,
    )(x_flat, w1, b1, w2, b2)

    # Drop class padding (batch padding never materialized).
    return out[:, :num_classes]


# ---------------------------------------------------------------------------
# Parameter init (the "sub-models"): W1 weights in bf16, the rest in f32.
# ---------------------------------------------------------------------------
def init_params(key, in_dim, hidden, num_classes):
    ks = jax.random.split(key, 8)
    s1 = 1.0 / jnp.sqrt(in_dim)
    s2 = 1.0 / jnp.sqrt(hidden)
    w1a = (jax.random.normal(ks[0], (in_dim, hidden), jnp.float32) * s1).astype(jnp.bfloat16)
    b1a = jax.random.normal(ks[1], (1, hidden), jnp.float32) * 0.01
    w2a = jax.random.normal(ks[2], (hidden, num_classes), jnp.float32) * s2
    b2a = jax.random.normal(ks[3], (1, num_classes), jnp.float32) * 0.01
    w1b = (jax.random.normal(ks[4], (in_dim, hidden), jnp.float32) * s1).astype(jnp.bfloat16)
    b1b = jax.random.normal(ks[5], (1, hidden), jnp.float32) * 0.01
    w2b = jax.random.normal(ks[6], (hidden, num_classes), jnp.float32) * s2
    b2b = jax.random.normal(ks[7], (1, num_classes), jnp.float32) * 0.01
    return (w1a, b1a, w2a, b2a, w1b, b1b, w2b, b2b)


# Pure-JAX reference: two separate MLPs + explicit (a + b) / 2 average.
# (Second GEMM stays f32 here; the kernel uses bf16 operands with f32
#  accumulation, hence the slightly relaxed tolerance below.)
def reference_forward(x_nchw, params):
    (w1a, b1a, w2a, b2a, w1b, b1b, w2b, b2b) = params
    x = x_nchw.reshape(x_nchw.shape[0], -1).astype(jnp.bfloat16)
    ha = jnp.maximum(jnp.dot(x, w1a, preferred_element_type=jnp.float32) + b1a, 0.0)
    hb = jnp.maximum(jnp.dot(x, w1b, preferred_element_type=jnp.float32) + b1b, 0.0)
    oa = jnp.dot(ha, w2a, preferred_element_type=jnp.float32) + b2a
    ob = jnp.dot(hb, w2b, preferred_element_type=jnp.float32) + b2b
    return (oa + ob) / 2.0


if __name__ == "__main__":
    B, C, H, W = 2, 4, 16, 16
    hidden, num_classes = 32, 10
    in_dim = C * H * W

    key = jax.random.PRNGKey(0)
    k_x, k_p = jax.random.split(key)
    x = jax.random.normal(k_x, (B, C, H, W), jnp.float32)

    params = init_params(k_p, in_dim, hidden, num_classes)
    fused = fuse_and_pad_params(params)

    out = ensemble_forward(x, fused, num_classes)
    out = jax.block_until_ready(out)

    ref = reference_forward(x, params)
    assert out.shape == (B, num_classes)
    # Tolerance covers the bf16 second-GEMM operands in the kernel vs the f32
    # second GEMM in the reference.
    assert jnp.allclose(out, ref, atol=3e-2, rtol=2e-2), "mismatch vs reference"

    print("KERNEL_OK")
</pallas_src>

<mosaic_0001>
module attributes {stable_mosaic.version = 11 : i64} {
  func.func @ensemble_kernel(%arg0: i32, %arg1: memref<16x1024xf32, #tpu.memory_space<vmem>>, %arg2: memref<1024x128xbf16, #tpu.memory_space<vmem>>, %arg3: memref<1x128xf32, #tpu.memory_space<vmem>>, %arg4: memref<128x128xbf16, #tpu.memory_space<vmem>>, %arg5: memref<1x128xf32, #tpu.memory_space<vmem>>, %arg6: memref<16x128xf32, #tpu.memory_space<vmem>>) attributes {dimension_semantics = [#tpu.dimension_semantics<parallel>], iteration_bounds = array<i64: 1>, scalar_prefetch = 0 : i64, scratch_operands = 0 : i64, tpu.core_type = #tpu.core_type<tc>, window_params = [{transform_indices = @transform_0, window_bounds = array<i64: 16, 1024>}, {pipeline_mode = #tpu.pipeline_mode<synchronous>, transform_indices = @transform_1, window_bounds = array<i64: 1024, 128>}, {pipeline_mode = #tpu.pipeline_mode<synchronous>, transform_indices = @transform_2, window_bounds = array<i64: 1, 128>}, {pipeline_mode = #tpu.pipeline_mode<synchronous>, transform_indices = @transform_3, window_bounds = array<i64: 128, 128>}, {pipeline_mode = #tpu.pipeline_mode<synchronous>, transform_indices = @transform_4, window_bounds = array<i64: 1, 128>}, {transform_indices = @transform_5, window_bounds = array<i64: 16, 128>}]} {
    %c0 = arith.constant 0 : index
    %c0_0 = arith.constant 0 : index
    %0 = vector.load %arg1[%c0, %c0_0] : memref<16x1024xf32, #tpu.memory_space<vmem>>, vector<16x1024xf32>
    %1 = arith.truncf %0 : vector<16x1024xf32> to vector<16x1024xbf16>
    %c0_1 = arith.constant 0 : index
    %c0_2 = arith.constant 0 : index
    %2 = vector.load %arg2[%c0_1, %c0_2] : memref<1024x128xbf16, #tpu.memory_space<vmem>>, vector<1024x128xbf16>
    %cst = arith.constant dense<0.000000e+00> : vector<16x128xf32>
    %3 = tpu.matmul %1, %2, %cst {dimension_numbers = #tpu.dot_dimension_numbers<[1], [0], [0], [1], [0, 0, 1, 1], [], []>} : vector<16x1024xbf16>, vector<1024x128xbf16>, vector<16x128xf32> -> vector<16x128xf32>
    %c0_3 = arith.constant 0 : index
    %c0_4 = arith.constant 0 : index
    %4 = vector.load %arg3[%c0_3, %c0_4] : memref<1x128xf32, #tpu.memory_space<vmem>>, vector<1x128xf32>
    %5 = vector.broadcast %4 : vector<1x128xf32> to vector<16x128xf32>
    %6 = arith.addf %3, %5 : vector<16x128xf32>
    %cst_5 = arith.constant 0.000000e+00 : f32
    %7 = vector.broadcast %cst_5 : f32 to vector<16x128xf32>
    %8 = arith.maximumf %6, %7 : vector<16x128xf32>
    %9 = arith.truncf %8 : vector<16x128xf32> to vector<16x128xbf16>
    %c0_6 = arith.constant 0 : index
    %c0_7 = arith.constant 0 : index
    %10 = vector.load %arg4[%c0_6, %c0_7] : memref<128x128xbf16, #tpu.memory_space<vmem>>, vector<128x128xbf16>
    %cst_8 = arith.constant dense<0.000000e+00> : vector<16x128xf32>
    %11 = tpu.matmul %9, %10, %cst_8 {dimension_numbers = #tpu.dot_dimension_numbers<[1], [0], [0], [1], [0, 0, 1, 1], [], []>} : vector<16x128xbf16>, vector<128x128xbf16>, vector<16x128xf32> -> vector<16x128xf32>
    %c0_9 = arith.constant 0 : index
    %c0_10 = arith.constant 0 : index
    %12 = vector.load %arg5[%c0_9, %c0_10] : memref<1x128xf32, #tpu.memory_space<vmem>>, vector<1x128xf32>
    %13 = vector.broadcast %12 : vector<1x128xf32> to vector<16x128xf32>
    %14 = arith.addf %11, %13 : vector<16x128xf32>
    %c0_11 = arith.constant 0 : index
    %c0_12 = arith.constant 0 : index
    %15 = vector.load %arg6[%c0_11, %c0_12] : memref<16x128xf32, #tpu.memory_space<vmem>>, vector<16x128xf32>
    tpu.vector_store %arg6[%c0_11, %c0_12], %14 {strides = array<i32>} : memref<16x128xf32, #tpu.memory_space<vmem>>, vector<16x128xf32>,
    return
  }
  func.func @transform_0(%arg0: i32) -> (i32, i32) {
    %c0_i32 = arith.constant 0 : i32
    %c0_i32_0 = arith.constant 0 : i32
    return %arg0, %c0_i32 : i32, i32
  }
  func.func @transform_1(%arg0: i32) -> (i32, i32) {
    %c0_i32 = arith.constant 0 : i32
    %c0_i32_0 = arith.constant 0 : i32
    %c0_i32_1 = arith.constant 0 : i32
    return %c0_i32, %c0_i32_0 : i32, i32
  }
  func.func @transform_2(%arg0: i32) -> (i32, i32) {
    %c0_i32 = arith.constant 0 : i32
    %c0_i32_0 = arith.constant 0 : i32
    %c0_i32_1 = arith.constant 0 : i32
    return %c0_i32, %c0_i32_0 : i32, i32
  }
  func.func @transform_3(%arg0: i32) -> (i32, i32) {
    %c0_i32 = arith.constant 0 : i32
    %c0_i32_0 = arith.constant 0 : i32
    %c0_i32_1 = arith.constant 0 : i32
    return %c0_i32, %c0_i32_0 : i32, i32
  }
  func.func @transform_4(%arg0: i32) -> (i32, i32) {
    %c0_i32 = arith.constant 0 : i32
    %c0_i32_0 = arith.constant 0 : i32
    %c0_i32_1 = arith.constant 0 : i32
    return %c0_i32, %c0_i32_0 : i32, i32
  }
  func.func @transform_5(%arg0: i32) -> (i32, i32) {
    %c0_i32 = arith.constant 0 : i32
    %c0_i32_0 = arith.constant 0 : i32
    return %arg0, %c0_i32 : i32, i32
  }
}

</mosaic_0001>

<bundles_post_ra>
// kernel: tpu_custom_call.1
= control target key start
LH: loop header
LB: loop body
LE: loop exit
PB: predicated region body
PF: predicated region fallthrough
CT: control target
= control target key end

     0   :  { %10 = vsyncpa [#allocation3], 0  ;;  %s1596_s0 = inlined_call_operand.hbm [shape: f32[2,1024], index: 0, kind: input, shape index: {}]   ;;  %s1597_s1 = inlined_call_operand.hbm [shape: bf16[1024,128], index: 1, kind: input, shape index: {}]   ;;  %s1598_s2 = inlined_call_operand.vmem [shape: f32[1,128], index: 2, kind: input, shape index: {}]   ;;  %s1599_s3 = inlined_call_operand.hbm [shape: bf16[128,128], index: 3, kind: input, shape index: {}]   ;;  %s1600_s4 = inlined_call_operand.vmem [shape: f32[1,128], index: 4, kind: input, shape index: {}]   ;;  %s1601_s5 = inlined_call_operand.hbm [shape: f32[2,128], index: 5, kind: output, shape index: {}]  }
   0x1   :  { %11 = vsyncpa [#allocation6], 0 }
   0x2   :  { %12 = vsyncpa [#allocation4], 0 }
   0x3   :  { %17 = vsyncadd [#allocation3], 1792  ;;  %s1475_s18 = smov [#allocation5]   ;;  %s1381_s22 = scalar_lea.hbm %s1597_s1, 8192 }
   0x4   :  { %s30_s19 = sshll.u32 %s1475_s18, 4  ;;  %p1382_p0 = scmp.ne.s32.totalorder %s1597_s1, %s1381_s22  ;;  %s31_s19 = int_to_ptr.vmem [resolvable:$true] %s30_s19 }
   0x5   :  { %p1385_p1 = scmp.lt.u32.totalorder %s1381_s22, %s1597_s1 }
   0x7   :  { %p1387_p2 = pnand %p1385_p1, %p1382_p0 }
   0x9   :  { %1390 = shalt.err (!%p1387_p2)
}
   0xa   :  { %s1391_s27 = scalar_lea.vmem %s31_s19, 8192  ;;  %p1396_p4 = scmp.lt.s32.totalorder %s31_s19, %s31_s19 }
   0xb   :  { %p1392_p3 = scmp.ne.s32.totalorder %s31_s19, %s1391_s27  ;;  %p1397_p5 = scmp.lt.s32.totalorder %s1391_s27, %s1391_s27 }
   0xd   :  { %p1398_p6 = por %p1397_p5, %p1396_p4 }
   0xf   :  { %p1399_p7 = pnand %p1398_p6, %p1392_p3 }
  0x11   :  { %1402 = shalt.err (!%p1399_p7)
}
  0x12   :  { %s1476_s28 = smov 64   ;;  %s1477_s29 = smov 4  }
  0x13   :  { %36 = dma.hbm_to_vmem [thread:$0]  %s1597_s1, 8192, %s31_s19, [#allocation6], %s1476_s28, %s1476_s28, %s1477_s29  }
  0x14   :  { %s1478_s7 = smov [#allocation2]   ;;  %s1403_s11 = scalar_lea.hbm %s1596_s0, 256 }
  0x15   :  { %s18_s8 = sshll.u32 %s1478_s7, 4  ;;  %p1404_p8 = scmp.ne.s32.totalorder %s1596_s0, %s1403_s11  ;;  %s19_s8 = int_to_ptr.vmem [resolvable:$true] %s18_s8 }
  0x16   :  { %p1407_p9 = scmp.lt.u32.totalorder %s1403_s11, %s1596_s0 }
  0x18   :  { %p1409_p10 = pnand %p1407_p9, %p1404_p8 }
  0x1a   :  { %1412 = shalt.err (!%p1409_p10)
}
  0x1b   :  { %s1413_s16 = scalar_lea.vmem %s19_s8, 256  ;;  %s1417_s1 = scalar_lea.vmem %s19_s8, 2048 }
  0x1c   :  { %p1414_p11 = scmp.ne.s32.totalorder %s19_s8, %s1413_s16  ;;  %p1418_p12 = scmp.lt.s32.totalorder %s19_s8, %s19_s8 }
  0x1d   :  { %p1419_p13 = scmp.lt.s32.totalorder %s1417_s1, %s1413_s16 }
  0x1f   :  { %p1420_p0 = por %p1419_p13, %p1418_p12 }
  0x21   :  { %p1421_p1 = pnand %p1420_p0, %p1414_p11 }
  0x23   :  { %1424 = shalt.err (!%p1421_p1)
}
  0x24   :  { %s1479_s17 = smov 256   ;;  %s1480_s18 = smov 16  }
  0x25   :  { %24 = dma.hbm_to_vmem [thread:$0]  %s1596_s0, 256, %s19_s8, [#allocation3], %s1479_s17, %s1479_s17, %s1480_s18  }
  0x26   :  { %s1481_s21 = smov [#allocation7]   ;;  %s1425_s25 = scalar_lea.hbm %s1599_s3, 1024 }
  0x27   :  { %s44_s22 = sshll.u32 %s1481_s21, 4  ;;  %p1426_p2 = scmp.ne.s32.totalorder %s1599_s3, %s1425_s25  ;;  %s45_s22 = int_to_ptr.vmem [resolvable:$true] %s44_s22 }
  0x28   :  { %p1429_p3 = scmp.lt.u32.totalorder %s1425_s25, %s1599_s3 }
  0x2a   :  { %p1431_p4 = pnand %p1429_p3, %p1426_p2 }
  0x2c   :  { %1434 = shalt.err (!%p1431_p4)
}
  0x2d   :  { %s1435_s7 = scalar_lea.vmem %s45_s22, 1024  ;;  %p1440_p6 = scmp.lt.s32.totalorder %s45_s22, %s45_s22 }
  0x2e   :  { %p1436_p5 = scmp.ne.s32.totalorder %s45_s22, %s1435_s7  ;;  %p1441_p7 = scmp.lt.s32.totalorder %s1435_s7, %s1435_s7 }
  0x30   :  { %p1442_p8 = por %p1441_p7, %p1440_p6 }
  0x32   :  { %p1443_p9 = pnand %p1442_p8, %p1436_p5 }
  0x34   :  { %1446 = shalt.err (!%p1443_p9)
}
  0x35   :  { %50 = dma.hbm_to_vmem [thread:$0]  %s1599_s3, 1024, %s45_s22, [#allocation6], %s1476_s28, %s1476_s28, %s1477_s29  }
  0x36   :  { %1469 = dma.done.wait [#allocation3], 2048  }
  0x37   :  { %1470 = vsyncadd [#allocation3], 4294965248 }
  0x38   :  { %1471 = dma.done.wait [#allocation6], 9216  }
  0x39   :  { %1472 = vsyncadd [#allocation6], 4294958080  ;;  %v1285_v0 = vld [vmem:[#allocation5 + $0x40] sm:$0xff]   ;;  %v1289_v4 = vld [vmem:[#allocation5 + $0x48] sm:$0xff]   ;;  %v1482_v25 = vmov 1983009808   ;;  %v102_v27 = vlaneseq }
  0x3a   :  { %v1286_v1 = vld [vmem:[#allocation5 + $0xc0] sm:$0xff]   ;;  %1155 = vmatprep.subr.bf16.mxu0 %v1285_v0  ;;  %v1290_v5 = vld [vmem:[#allocation5 + $0xc8] sm:$0xff]   ;;  %v1293_v8 = vld [vmem:[#allocation5 + $0x50] sm:$0xff]   ;;  %v100_v26 = vunpack.c.l.s4 %v1482_v25  ;;  %vm1484_vm0 = vmmov 0  }
  0x3b   :  { %v1287_v2 = vld [vmem:[#allocation5] sm:$0xff]   ;;  %1177 = vmatprep.subr.bf16.mxu1 %v1286_v1  ;;  %v1291_v6 = vld [vmem:[#allocation5 + $0x8] sm:$0xff]   ;;  %v1294_v9 = vld [vmem:[#allocation5 + $0xd0] sm:$0xff]   ;;  %v103_v33 = vshrl.u32 %v102_v27, 7 }
  0x3c   :  { %v1288_v3 = vld [vmem:[#allocation5 + $0x80] sm:$0xff]   ;;  %1156 = vmatpush3.bf16.msra.mxu0 %v1287_v2  ;;  %v1292_v7 = vld [vmem:[#allocation5 + $0x88] sm:$0xff]   ;;  %v1295_v10 = vld [vmem:[#allocation5 + $0x10] sm:$0xff]   ;;  %v101_v32 = vunpack.c.0.s8 %v100_v26 }
  0x3d   :  { %1178 = vmatpush3.bf16.msra.mxu1 %v1288_v3  ;;  %1157 = vmatprep.subr.bf16.mxu0 %v1289_v4  ;;  %v1296_v11 = vld [vmem:[#allocation5 + $0x90] sm:$0xff]   ;;  %v1297_v12 = vld [vmem:[#allocation5 + $0x58] sm:$0xff]   ;;  %v1301_v16 = vld [vmem:[#allocation5 + $0x60] sm:$0xff]  }
  0x3e   :  { %1179 = vmatprep.subr.bf16.mxu1 %v1290_v5  ;;  %v1298_v13 = vld [vmem:[#allocation5 + $0xd8] sm:$0xff]   ;;  %v1302_v17 = vld [vmem:[#allocation5 + $0xe0] sm:$0xff]   ;;  %v1305_v20 = vld [vmem:[#allocation5 + $0x68] sm:$0xff]   ;;  %v1560_v37 = vsub.s32 %v101_v32, %v103_v33 }
  0x3f   :  { %v1299_v14 = vld [vmem:[#allocation5 + $0x18] sm:$0xff]   ;;  %v1303_v18 = vld [vmem:[#allocation5 + $0x20] sm:$0xff]   ;;  %v1306_v21 = vld [vmem:[#allocation5 + $0xe8] sm:$0xff]  }
  0x40   :  { %1158 = vmatpush3.bf16.msra.mxu0 %v1291_v6  ;;  %v1300_v15 = vld [vmem:[#allocation5 + $0x98] sm:$0xff]   ;;  %v1304_v19 = vld [vmem:[#allocation5 + $0xa0] sm:$0xff]   ;;  %v1307_v22 = vld [vmem:[#allocation5 + $0x28] sm:$0xff]  }
  0x41   :  { %1180 = vmatpush3.bf16.msra.mxu1 %v1292_v7  ;;  %1159 = vmatprep.subr.bf16.mxu0 %v1293_v8  ;;  %v1308_v23 = vld [vmem:[#allocation5 + $0xa8] sm:$0xff]   ;;  %v1309_v24 = vld [vmem:[#allocation5 + $0x70] sm:$0xff]   ;;  %v1313_v31 = vld [vmem:[#allocation5 + $0x78] sm:$0xff]  }
  0x42   :  { %1181 = vmatprep.subr.bf16.mxu1 %v1294_v9  ;;  %v1310_v28 = vld [vmem:[#allocation5 + $0xf0] sm:$0xff]   ;;  %v1314_v34 = vld [vmem:[#allocation5 + $0xf8] sm:$0xff]   ;;  %v1329_v53 = vld [vmem:[#allocation5 + $0x140] sm:$0xff]  }
  0x43   :  { %v1311_v29 = vld [vmem:[#allocation5 + $0x30] sm:$0xff]   ;;  %v1315_v35 = vld [vmem:[#allocation5 + $0x38] sm:$0xff]   ;;  %v1330_v58 = vld [vmem:[#allocation5 + $0x1c0] sm:$0xff]  }
  0x44   :  { %1160 = vmatpush3.bf16.msra.mxu0 %v1295_v10  ;;  %v1312_v30 = vld [vmem:[#allocation5 + $0xb0] sm:$0xff]   ;;  %v1316_v36 = vld [vmem:[#allocation5 + $0xb8] sm:$0xff]   ;;  %v1331_v62 = vld [vmem:[#allocation5 + $0x100] sm:$0xff]  }
  0x45   :  { %1182 = vmatpush3.bf16.msra.mxu1 %v1296_v11  ;;  %1161 = vmatprep.subr.bf16.mxu0 %v1297_v12  ;;  %v1317_v38 = vld [vmem:[#allocation2] ss:$16 sps:$4 sm:$0xff]   ;;  %v1325_v43 = vld [vmem:[#allocation2 + $0x4] ss:$16 sps:$4 sm:$0xff]   ;;  %v1333_v4 = vld [vmem:[#allocation5 + $0x148] sm:$0xff]  }
  0x46   :  { %1183 = vmatprep.subr.bf16.mxu1 %v1298_v13  ;;  %v1319_v39 = vld [vmem:[#allocation2 + $0x20] ss:$16 sps:$4 sm:$0xff]   ;;  %v105_v42 = vrot.slane %v1317_v38, %v1560_v37  ;;  %v1326_v44 = vld [vmem:[#allocation2 + $0x24] ss:$16 sps:$4 sm:$0xff]   ;;  %v112_v50 = vrot.slane %v1325_v43, %v1560_v37  ;;  %v1334_v7 = vld [vmem:[#allocation5 + $0x1c8] sm:$0xff]  }
  0x47   :  { %v1321_v40 = vld [vmem:[#allocation2 + $0x40] ss:$16 sps:$4 sm:$0xff]   ;;  %v1327_v45 = vld [vmem:[#allocation2 + $0x44] ss:$16 sps:$4 sm:$0xff]   ;;  %v119_v46 = vrot.slane %v1319_v39, %v1560_v37  ;;  %v126_v51 = vrot.slane %v1326_v44, %v1560_v37  ;;  %v1335_v8 = vld [vmem:[#allocation5 + $0x108] sm:$0xff]  }
  0x48   :  { %1162 = vmatpush3.bf16.msra.mxu0 %v1299_v14  ;;  %v1323_v41 = vld [vmem:[#allocation2 + $0x60] ss:$16 sps:$4 sm:$0xff]   ;;  %v177_v47 = vrot.slane %v1321_v40, %v1560_v37  ;;  %v1328_v49 = vld [vmem:[#allocation2 + $0x64] ss:$16 sps:$4 sm:$0xff]   ;;  %v184_v52 = vrot.slane %v1327_v45, %v1560_v37  ;;  %v1336_v9 = vld [vmem:[#allocation5 + $0x188] sm:$0xff]  }
  0x49   :  { %1184 = vmatpush3.bf16.msra.mxu1 %v1300_v15  ;;  %1163 = vmatprep.subr.bf16.mxu0 %v1301_v16  ;;  %v191_v48 = vrot.slane %v1323_v41, %v1560_v37  ;;  %v128_v54 = vcombine.high %v105_v42, %v119_v46  ;;  %v198_v56 = vrot.slane %v1328_v49, %v1560_v37  ;;  %v1332_v2 = vld [vmem:[#allocation5 + $0x180] sm:$0xff]   ;;  %v1337_v10 = vld [vmem:[#allocation5 + $0x150] sm:$0xff]   ;;  %v1341_v14 = vld [vmem:[#allocation5 + $0x158] sm:$0xff]  }
  0x4a   :  { %1185 = vmatprep.subr.bf16.mxu1 %v1302_v17  ;;  %v127_v57 = vcombine.low %v105_v42, %v119_v46  ;;  %v130_v59 = vcombine.high %v112_v50, %v126_v51  ;;  %v129_v61 = vcombine.low %v112_v50, %v126_v51  ;;  %v1338_v11 = vld [vmem:[#allocation5 + $0x1d0] sm:$0xff]   ;;  %v1342_v15 = vld [vmem:[#allocation5 + $0x1d8] sm:$0xff]   ;;  %v1352_v25 = vld [vmem:[#allocation5 + $0x1a8] sm:$0xff]  }
  0x4b   :  { %v200_v55 = vcombine.high %v177_v47, %v191_v48  ;;  %v199_v60 = vcombine.low %v177_v47, %v191_v48  ;;  %v202_v0 = vcombine.high %v184_v52, %v198_v56  ;;  %v201_v1 = vcombine.low %v184_v52, %v198_v56  ;;  %v1339_v12 = vld [vmem:[#allocation5 + $0x110] sm:$0xff]   ;;  %v1343_v16 = vld [vmem:[#allocation5 + $0x118] sm:$0xff]  }
  0x4c   :  { %1164 = vmatpush3.bf16.msra.mxu0 %v1303_v18  ;;  %v1340_v13 = vld [vmem:[#allocation5 + $0x190] sm:$0xff]   ;;  %v1344_v17 = vld [vmem:[#allocation5 + $0x198] sm:$0xff]   ;;  %v1345_v18 = vld [vmem:[#allocation5 + $0x160] sm:$0xff]  }
  0x4d   :  { %1186 = vmatpush3.bf16.msra.mxu1 %v1304_v19  ;;  %1165 = vmatprep.subr.bf16.mxu0 %v1305_v20  ;;  %v256_v63 = vpack.c.bf16 %v200_v55, %v128_v54  ;;  %v255_v3 = vpack.c.bf16 %v199_v60, %v127_v57  ;;  %v258_v5 = vpack.c.bf16 %v202_v0, %v130_v59  ;;  %v1346_v19 = vld [vmem:[#allocation5 + $0x1e0] sm:$0xff]   ;;  %v1353_v26 = vld [vmem:[#allocation5 + $0x170] sm:$0xff]   ;;  %v1359_v32 = vld [vmem:[#allocation5 + $0x138] sm:$0xff]   ;;  %v1483_v0 = vmov 0.0  }
  0x4e   :  { %1187 = vmatprep.subr.bf16.mxu1 %v1306_v21  ;;  %v257_v6 = vpack.c.bf16 %v201_v1, %v129_v61  ;;  %v1347_v20 = vld [vmem:[#allocation5 + $0x120] sm:$0xff]   ;;  %v1354_v27 = vld [vmem:[#allocation5 + $0x1f0] sm:$0xff]   ;;  %v1360_v33 = vld [vmem:[#allocation5 + $0x1b8] sm:$0xff]  }
  0x4f   :  { %814 = vmatprep.mubr.bf16.mxu0 %v256_v63  ;;  %855 = vmatprep.mubr.bf16.mxu1 %v258_v5  ;;  %v1348_v21 = vld [vmem:[#allocation5 + $0x1a0] sm:$0xff]   ;;  %v1367_v38 = vld [vmem:[#allocation2 + $0x68] ss:$16 sps:$4 sm:$0xff]   ;;  %v1369_v39 = vld [vmem:[#allocation2 + $0xc] ss:$16 sps:$4 sm:$0xff]  }
  0x50   :  { %1166 = vmatpush3.bf16.msra.mxu0 %v1307_v22  ;;  %v1349_v22 = vld [vmem:[#allocation5 + $0x168] sm:$0xff]   ;;  %v227_v46 = vrot.slane %v1367_v38, %v1560_v37  ;;  %v148_v47 = vrot.slane %v1369_v39, %v1560_v37  ;;  %v1373_v63 = vld [vmem:[#allocation7] sm:$0xff]   ;;  %v1375_v1 = vld [vmem:[#allocation7 + $0x10] sm:$0xff]  }
  0x51   :  { %1188 = vmatpush3.bf16.msra.mxu1 %v1308_v23  ;;  %1167 = vmatprep.subr.bf16.mxu0 %v1309_v24  ;;  %v1350_v23 = vld [vmem:[#allocation5 + $0x1e8] sm:$0xff]   ;;  %v1379_v5 = vld [vmem:[#allocation7 + $0x30] sm:$0xff]  }
  0x52   :  { %1189 = vmatprep.subr.bf16.mxu1 %v1310_v28  ;;  %v1351_v24 = vld [vmem:[#allocation5 + $0x128] sm:$0xff]   ;;  %v1355_v28 = vld [vmem:[#allocation5 + $0x130] sm:$0xff]  }
  0x53   :  { %v1370_v40 = vld [vmem:[#allocation2 + $0x2c] ss:$16 sps:$4 sm:$0xff]  }
  0x54   :  { %1168 = vmatpush3.bf16.msra.mxu0 %v1311_v29  ;;  %v1356_v29 = vld [vmem:[#allocation5 + $0x1b0] sm:$0xff]   ;;  %v1371_v44 = vld [vmem:[#allocation2 + $0x4c] ss:$16 sps:$4 sm:$0xff]   ;;  %v162_v48 = vrot.slane %v1370_v40, %v1560_v37 }
  0x55   :  { %1190 = vmatpush3.bf16.msra.mxu1 %v1312_v30  ;;  %1169 = vmatprep.subr.bf16.mxu0 %v1313_v31  ;;  %v1357_v30 = vld [vmem:[#allocation5 + $0x178] sm:$0xff]   ;;  %v220_v50 = vrot.slane %v1371_v44, %v1560_v37  ;;  %v1146_v44 = vld [vmem:[%s1600_s4] ss:$0 sm:$0xff] }
  0x56   :  { %1191 = vmatprep.subr.bf16.mxu1 %v1314_v34  ;;  %v1358_v31 = vld [vmem:[#allocation5 + $0x1f8] sm:$0xff]   ;;  %v166_v54 = vcombine.high %v148_v47, %v162_v48  ;;  %v165_v56 = vcombine.low %v148_v47, %v162_v48 }
  0x57   :  { %v1361_v34 = vld [vmem:[#allocation2 + $0x8] ss:$16 sps:$4 sm:$0xff]   ;;  %v1372_v45 = vld [vmem:[#allocation2 + $0x6c] ss:$16 sps:$4 sm:$0xff]  }
  0x58   :  { %1170 = vmatpush3.bf16.msra.mxu0 %v1315_v35  ;;  %v1363_v35 = vld [vmem:[#allocation2 + $0x28] ss:$16 sps:$4 sm:$0xff]   ;;  %v141_v41 = vrot.slane %v1361_v34, %v1560_v37  ;;  %v234_v51 = vrot.slane %v1372_v45, %v1560_v37 }
  0x59   :  { %1192 = vmatpush3.bf16.msra.mxu1 %v1316_v36  ;;  %1199 = vmatprep.subr.bf16.mxu0 %v1329_v53  ;;  %v1365_v36 = vld [vmem:[#allocation2 + $0x48] ss:$16 sps:$4 sm:$0xff]   ;;  %v155_v42 = vrot.slane %v1363_v35, %v1560_v37 }
  0x5a   :  { %1221 = vmatprep.subr.bf16.mxu1 %v1330_v58  ;;  %v213_v43 = vrot.slane %v1365_v36, %v1560_v37  ;;  %v238_v57 = vcombine.high %v220_v50, %v234_v51  ;;  %v237_v58 = vcombine.low %v220_v50, %v234_v51  ;;  %v1374_v37 = vld [vmem:[#allocation7 + $0x8] sm:$0xff]  }
  0x5b   :  { %815 = vmatmul.mubr.bf16.vlgmr.msra.gmra.mrb[0].mxu0 %v255_v3  ;;  %v164_v49 = vcombine.high %v141_v41, %v155_v42  ;;  %v163_v52 = vcombine.low %v141_v41, %v155_v42  ;;  %v1377_v3 = vld [vmem:[#allocation7 + $0x20] sm:$0xff]  }
  0x5c   :  { %1200 = vmatpush3.bf16.msra.mxu0 %v1331_v62  ;;  %856 = vmatmul.mubr.bf16.vlgmr.msra.gmra.mrb[0].mxu1 %v257_v6  ;;  %v236_v53 = vcombine.high %v213_v43, %v227_v46  ;;  %v235_v55 = vcombine.low %v213_v43, %v227_v46  ;;  %v262_v61 = vpack.c.bf16 %v238_v57, %v166_v54  ;;  %v1380_v6 = vld [vmem:[#allocation7 + $0x38] sm:$0xff]  }
  0x5d   :  { %1201 = vmatprep.subr.bf16.mxu0 %v1333_v4  ;;  %1222 = vmatpush3.bf16.msra.mxu1 %v1332_v2  ;;  %v261_v62 = vpack.c.bf16 %v237_v58, %v165_v56  ;;  %v1376_v2 = vld [vmem:[#allocation7 + $0x18] sm:$0xff]   ;;  %v1378_v4 = vld [vmem:[#allocation7 + $0x28] sm:$0xff]  }
  0x5e   :  { %1223 = vmatprep.subr.bf16.mxu1 %v1334_v7  ;;  %v260_v59 = vpack.c.bf16 %v236_v53, %v164_v49  ;;  %v259_v60 = vpack.c.bf16 %v235_v55, %v163_v52  ;;  %937 = vmatprep.mubr.bf16.mxu1 %v262_v61 }
  0x60   :  { %1202 = vmatpush3.bf16.msra.mxu0 %v1335_v8  ;;  %896 = vmatprep.mubr.bf16.mxu0 %v260_v59  ;;  %v1081_v8 = vld [vmem:[%s1598_s2] ss:$0 sm:$0xff] }
  0x61   :  { %1203 = vmatprep.subr.bf16.mxu0 %v1337_v10  ;;  %1224 = vmatpush3.bf16.msra.mxu1 %v1336_v9 }
  0x62   :  { %1225 = vmatprep.subr.bf16.mxu1 %v1338_v11 }
  0x64   :  { %1204 = vmatpush3.bf16.msra.mxu0 %v1339_v12 }
  0x65   :  { %1205 = vmatprep.subr.bf16.mxu0 %v1341_v14  ;;  %1226 = vmatpush3.bf16.msra.mxu1 %v1340_v13 }
  0x66   :  { %1227 = vmatprep.subr.bf16.mxu1 %v1342_v15 }
  0x68   :  { %1206 = vmatpush3.bf16.msra.mxu0 %v1343_v16 }
  0x69   :  { %1207 = vmatprep.subr.bf16.mxu0 %v1345_v18  ;;  %1228 = vmatpush3.bf16.msra.mxu1 %v1344_v17 }
  0x6a   :  { %1229 = vmatprep.subr.bf16.mxu1 %v1346_v19 }
  0x6c   :  { %1208 = vmatpush3.bf16.msra.mxu0 %v1347_v20 }
  0x6d   :  { %1209 = vmatprep.subr.bf16.mxu0 %v1349_v22  ;;  %1230 = vmatpush3.bf16.msra.mxu1 %v1348_v21 }
  0x6e   :  { %1231 = vmatprep.subr.bf16.mxu1 %v1350_v23 }
  0x70   :  { %1210 = vmatpush3.bf16.msra.mxu0 %v1351_v24 }
  0x71   :  { %1211 = vmatprep.subr.bf16.mxu0 %v1353_v26  ;;  %1232 = vmatpush3.bf16.msra.mxu1 %v1352_v25 }
  0x72   :  { %1233 = vmatprep.subr.bf16.mxu1 %v1354_v27 }
  0x74   :  { %1212 = vmatpush3.bf16.msra.mxu0 %v1355_v28 }
  0x75   :  { %1213 = vmatprep.subr.bf16.mxu0 %v1357_v30  ;;  %1234 = vmatpush3.bf16.msra.mxu1 %v1356_v29 }
  0x76   :  { %1235 = vmatprep.subr.bf16.mxu1 %v1358_v31 }
  0x78   :  { %1214 = vmatpush3.bf16.msra.mxu0 %v1359_v32 }
  0x79   :  { %1236 = vmatpush3.bf16.msra.mxu1 %v1360_v33  ;;  %1252 = vmatprep.subr.bf16.mxu0 %v1483_v0 }
  0x7b   :  { %897 = vmatmul.mubr.bf16.vlgmr.msra.gmra.mrb[4].mxu0 %v259_v60 }
  0x7c   :  { %938 = vmatmul.mubr.bf16.vlgmr.msra.gmra.mrb[4].mxu1 %v261_v62  ;;  %1253 = vmatpush3.bf16.msra.mxu0 %v1373_v63 }
  0x7d   :  { %1254 = vmatprep.subr.bf16.mxu0 %v1483_v0  ;;  %1268 = vmatprep.mubr.msk.bf16.mxu0 %vm1484_vm0, %v1483_v0 }
  0x80   :  { %1255 = vmatpush3.bf16.msra.mxu0 %v1374_v37 }
  0x81   :  { %1256 = vmatprep.subr.bf16.mxu0 %v1483_v0 }
  0x84   :  { %1257 = vmatpush3.bf16.msra.mxu0 %v1375_v1 }
  0x85   :  { %1258 = vmatprep.subr.bf16.mxu0 %v1483_v0 }
  0x88   :  { %1259 = vmatpush3.bf16.msra.mxu0 %v1376_v2 }
  0x89   :  { %1260 = vmatprep.subr.bf16.mxu0 %v1483_v0 }
  0x8c   :  { %1261 = vmatpush3.bf16.msra.mxu0 %v1377_v3 }
  0x8d   :  { %1262 = vmatprep.subr.bf16.mxu0 %v1483_v0 }
  0x90   :  { %1263 = vmatpush3.bf16.msra.mxu0 %v1378_v4 }
  0x91   :  { %1264 = vmatprep.subr.bf16.mxu0 %v1483_v0 }
  0x94   :  { %1265 = vmatpush3.bf16.msra.mxu0 %v1379_v5 }
  0x95   :  { %1266 = vmatprep.subr.bf16.mxu0 %v1483_v0 }
  0x98   :  { %1267 = vmatpush3.bf16.msra.mxu0 %v1380_v6 }
 0x12e   :  { %v1171_v7 = vpop.f32.mrb[0].mxu0 }
 0x12f   :  { %v1172_v9 = vpop.f32.mrb[1].mxu0  ;;  %v1193_v10 = vpop.f32.mrb[0].mxu1 }
 0x130   :  { %v1173_v11 = vadd.f32 %v1172_v9, %v1171_v7  ;;  %v1174_v12 = vpop.f32.mrb[2].mxu0  ;;  %v1194_v13 = vpop.f32.mrb[1].mxu1 }
 0x131   :  { %v1175_v14 = vpop.f32.mrb[3].mxu0  ;;  %v1195_v16 = vadd.f32 %v1194_v13, %v1193_v10  ;;  %v1196_v17 = vpop.f32.mrb[2].mxu1 }
 0x132   :  { %v817_v15 = vadd.f32 %v1173_v11, %v1081_v8  ;;  %v1176_v18 = vadd.f32 %v1175_v14, %v1174_v12  ;;  %v1197_v19 = vpop.f32.mrb[3].mxu1 }
 0x133   :  { %v1198_v22 = vadd.f32 %v1197_v19, %v1196_v17 }
 0x134   :  { %v858_v20 = vadd.f32 %v1195_v16, %v817_v15  ;;  %v820_v21 = vadd.f32 %v1176_v18, %v1081_v8 }
 0x136   :  { %v861_v23 = vadd.f32 %v1198_v22, %v820_v21 }
 0x14e   :  { %v1215_v24 = vpop.f32.mrb[4].mxu0 }
 0x14f   :  { %v1237_v25 = vpop.f32.mrb[4].mxu1  ;;  %v1216_v26 = vpop.f32.mrb[5].mxu0 }
 0x150   :  { %v1217_v27 = vadd.f32 %v1216_v26, %v1215_v24  ;;  %v1238_v28 = vpop.f32.mrb[5].mxu1  ;;  %v1218_v29 = vpop.f32.mrb[6].mxu0 }
 0x151   :  { %v1239_v30 = vadd.f32 %v1238_v28, %v1237_v25  ;;  %v1240_v31 = vpop.f32.mrb[6].mxu1  ;;  %v1219_v32 = vpop.f32.mrb[7].mxu0 }
 0x152   :  { %v899_v33 = vadd.f32 %v1217_v27, %v858_v20  ;;  %v1220_v34 = vadd.f32 %v1219_v32, %v1218_v29  ;;  %v1241_v35 = vpop.f32.mrb[7].mxu1 }
 0x153   :  { %v1242_v36 = vadd.f32 %v1241_v35, %v1240_v31 }
 0x154   :  { %v940_v38 = vadd.f32 %v1239_v30, %v899_v33  ;;  %v902_v39 = vadd.f32 %v1220_v34, %v861_v23 }
 0x156   :  { %v943_v40 = vadd.f32 %v1242_v36, %v902_v39  ;;  %v946_v41 = vmax.f32 %v940_v38, 0.0 }
 0x158   :  { %v947_v42 = vmax.f32 %v943_v40, 0.0 }
 0x15a   :  { %v948_v43 = vpack.c.bf16 %v947_v42, %v946_v41 }
 0x15c   :  { %1269 = vmatmul.mubr.bf16.vlgmr.msra.gmra.mrb[8].mxu0 %v948_v43 }
 0x22f   :  { %v1054_v45 = vpop.f32.mrb[8].mxu0 }
 0x230   :  { %v1055_v46 = vadd.f32 %v1146_v44, %v1054_v45  ;;  %v1270_v47 = vpop.f32.mrb[9].mxu0 }
 0x231   :  { %v1057_v48 = vpop.f32.mrb[10].mxu0 }
 0x232   :  { %1061 = vst [vmem:[#allocation8] sm:$0xff] %v1055_v46  ;;  %v1058_v49 = vadd.f32 %v1146_v44, %v1057_v48  ;;  %v1271_v50 = vpop.f32.mrb[11].mxu0 }
 0x234   :  { %1062 = vst [vmem:[#allocation8 + $0x8] sm:$0xff] %v1058_v49 }
 0x235   :  { %1067 = vsyncadd [#allocation4], 224  ;;  %s1485_s9 = smov [#allocation8]  }
 0x236   :  { %s1068_s10 = sshll.u32 %s1485_s9, 4  ;;  %s1069_s10 = int_to_ptr.vmem [resolvable:$true] %s1068_s10 }
 0x237   :  { %s1447_s11 = scalar_lea.vmem %s1069_s10, 32  ;;  %s1451_s12 = scalar_lea.vmem %s1069_s10, 256 }
 0x238   :  { %p1448_p10 = scmp.ne.s32.totalorder %s1069_s10, %s1447_s11  ;;  %p1452_p11 = scmp.lt.s32.totalorder %s1069_s10, %s1069_s10 }
 0x239   :  { %p1453_p12 = scmp.lt.s32.totalorder %s1451_s12, %s1447_s11 }
 0x23b   :  { %p1454_p13 = por %p1453_p12, %p1452_p11 }
 0x23d   :  { %p1455_p0 = pnand %p1454_p13, %p1448_p10 }
 0x23f   :  { %1458 = shalt.err (!%p1455_p0)
}
 0x240   :  { %s1459_s14 = scalar_lea.hbm %s1601_s5, 32 }
 0x241   :  { %p1460_p1 = scmp.ne.s32.totalorder %s1601_s5, %s1459_s14  ;;  %p1463_p2 = scmp.lt.u32.totalorder %s1459_s14, %s1601_s5 }
 0x243   :  { %p1465_p3 = pnand %p1463_p2, %p1460_p1 }
 0x245   :  { %1468 = shalt.err (!%p1465_p3)
}
 0x246   :  { %s1486_s18 = smov 32   ;;  %s1487_s19 = smov 2  }
 0x247   :  { %1074 = dma.vmem_to_hbm [thread:$0]  %s1069_s10, 32, %s1601_s5, [#allocation4], %s1486_s18, %s1486_s18, %s1487_s19  }
 0x248   :  { %1473 = dma.done.wait [#allocation4], 256  }
 0x249   :  { %1474 = vsyncadd [#allocation4], 4294967040 }
 0x24a   :  { %1078 = vsyncpa [#allocation3], 1 }
 0x24b   :  { %1079 = vsyncpa [#allocation6], 1 }
 0x24c   :  { %1080 = vsyncpa [#allocation4], 1 }

</bundles_post_ra>
